<compile_context>
chip_gen: v7x
topology: tpu7x:2x2x1
jax: 0.10.0
libtpu: 0.0.40
codegen_flags: <defaults>
</compile_context>

<pallas_src>
import functools

import jax
import jax.numpy as jnp
from jax.experimental import pallas as pl
from jax.experimental.pallas import tpu as pltpu


def _round_up(x, m):
    return ((x + m - 1) // m) * m


def _row_align(dtype):
    # Sublane packing: 8 rows/vreg at 32-bit, 16 at 16-bit, 32 at 8-bit.
    return max(8, 32 // jnp.dtype(dtype).itemsize)


# ----------------------------------------------------------------------------
# hidden_size > 0 path: fc1 (MXU) -> ReLU (VPU) -> fc2 (VPU+XLU) -> sigmoid (EUP)
# ----------------------------------------------------------------------------
def ffnn_kernel(x_ref, w1_ref, b1_ref, w2_ref, b2_ref, o_ref, *, matmul_dtype):
    # x arrives in its native streaming dtype; the cast to the MXU operand
    # dtype happens here, hidden under the tile DMA.  Weights were already
    # cast once in the wrapper, so no per-step cast of VMEM-resident data.
    x = x_ref[...].astype(matmul_dtype)                       # (tb, D)
    h = jnp.dot(x, w1_ref[...], preferred_element_type=jnp.float32)  # (tb, Hp) f32
    # bias + ReLU on the VPU (f32).
    h = jnp.maximum(h + b1_ref[...], 0.0)
    # fc2 (output width 1): VPU multiply + lane reduction instead of an MXU
    # matmul with a single live output column.
    y = jnp.sum(h * w2_ref[...], axis=-1, keepdims=True)      # (tb, 1)
    # scalar fc2 bias from SMEM, sigmoid via the EUP.
    o_ref[...] = jax.nn.sigmoid(y + b2_ref[0, 0]).astype(o_ref.dtype)


# ----------------------------------------------------------------------------
# hidden_size == 0 path: single Linear(2*input, 1) -> sigmoid
# ----------------------------------------------------------------------------
def ffnn_nohidden_kernel(x_ref, w_ref, b_ref, o_ref):
    x = x_ref[...].astype(jnp.float32)
    y = jnp.sum(x * w_ref[...], axis=-1, keepdims=True) + b_ref[0, 0]
    o_ref[...] = jax.nn.sigmoid(y).astype(o_ref.dtype)


def _pick_batch_tile(B, block_rows, align):
    tb = min(_round_up(block_rows, align), _round_up(B, align))
    # Keep at least two grid steps when the batch allows it, so v7x's two
    # TensorCores both get a shard of the "parallel" batch axis.
    if B > 2 * align and pl.cdiv(B, tb) < 2:
        tb = _round_up(pl.cdiv(B, 2), align)
    return tb


def ffnn_forward(x, w1, b1, w2=None, b2=None, *, block_rows=2048,
                 matmul_dtype=jnp.float32, vmem_budget_bytes=48 * (1 << 20)):
    """Pallas forward pass for FFNN.

    hidden_size > 0 :  x (B, 2*input)  w1 (2*input, H)  b1 (1, H)
                       w2 (H, 1)       b2 (1, 1)        -> (B, 1) f32
    hidden_size == 0:  call with w2=b2=None, w1 (2*input, 1), b1 (1, 1).

    x is streamed unpadded in its own dtype; pass bf16 x for ~2x less HBM
    traffic on the mem-bound path.  matmul_dtype=jnp.bfloat16 puts bf16
    operands on the MXU (f32 accumulate) and stores w1 as bf16 in VMEM.
    """
    B, D = x.shape
    align = _row_align(x.dtype)

    # ---------------- hidden_size == 0 branch ----------------
    if w2 is None:
        w_row = jnp.reshape(w1, (1, D)).astype(jnp.float32)
        b_s = jnp.reshape(b1, (1, 1)).astype(jnp.float32)
        tb = _pick_batch_tile(B, block_rows, align)
        nb = pl.cdiv(B, tb)
        return pl.pallas_call(
            ffnn_nohidden_kernel,
            out_shape=jax.ShapeDtypeStruct((B, 1), jnp.float32),
            grid=(nb,),
            in_specs=[
                pl.BlockSpec((tb, D), lambda i: (i, 0)),     # x, streamed
                pl.BlockSpec((1, D), lambda i: (0, 0)),      # w, resident
                pl.BlockSpec(memory_space=pltpu.MemorySpace.SMEM),  # scalar b
            ],
            out_specs=pl.BlockSpec((tb, 1), lambda i: (i, 0)),
            compiler_params=pltpu.CompilerParams(
                dimension_semantics=("parallel",)),
        )(x, w_row, b_s)

    # ---------------- hidden_size > 0 branch ----------------
    Din, H = w1.shape
    assert D == Din, (D, Din)

    # Pad only the tiny weight/bias arrays along H to the 128-lane width.
    # x and the w1 contraction dim stay unpadded (full-dim blocks are legal).
    Hp = _round_up(H, 128)
    w1p = jnp.zeros((D, Hp), matmul_dtype).at[:, :H].set(w1.astype(matmul_dtype))
    b1p = jnp.zeros((1, Hp), jnp.float32).at[:, :H].set(
        jnp.reshape(b1, (1, H)).astype(jnp.float32))
    w2p = jnp.zeros((1, Hp), jnp.float32).at[:, :H].set(
        jnp.reshape(w2, (1, H)).astype(jnp.float32))
    b2s = jnp.reshape(b2, (1, 1)).astype(jnp.float32)

    tb = _pick_batch_tile(B, block_rows, align)

    # VMEM budget (conservative, with (8,128)/lane padding of VMEM buffers):
    # x/out are double-buffered along the batch grid; weights are resident
    # (constant index_map) but still occupy two buffers by default.
    lane_D = _round_up(D, 128)
    w_sub = _round_up(D, _row_align(matmul_dtype))
    w_bytes = (2 * w_sub * Hp * jnp.dtype(matmul_dtype).itemsize   # w1
               + 2 * 2 * 8 * Hp * 4)                               # b1, w2

    def _stream_bytes(t):
        return (2 * t * lane_D * jnp.dtype(x.dtype).itemsize       # x tiles
                + 2 * t * 128 * 4)                                 # out tiles

    while tb > align and w_bytes + _stream_bytes(tb) > vmem_budget_bytes:
        tb = max(align, _round_up(tb // 2, align))
    nb = pl.cdiv(B, tb)

    vmem_limit = int(min(max(2 * (w_bytes + _stream_bytes(tb)), 32 * (1 << 20)),
                         vmem_budget_bytes))

    kernel = functools.partial(ffnn_kernel, matmul_dtype=matmul_dtype)

    out = pl.pallas_call(
        kernel,
        out_shape=jax.ShapeDtypeStruct((B, 1), jnp.float32),
        grid=(nb,),
        in_specs=[
            # X tile: streamed / double-buffered along the batch grid,
            # unpadded, native dtype.  Last batch tile is grid-masked.
            pl.BlockSpec((tb, D), lambda i: (i, 0)),
            # Weights / biases: VMEM-resident across all grid steps.
            pl.BlockSpec((D, Hp), lambda i: (0, 0)),
            pl.BlockSpec((1, Hp), lambda i: (0, 0)),
            pl.BlockSpec((1, Hp), lambda i: (0, 0)),
            # Scalar fc2 bias lives in SMEM (no (8,128)-padded VMEM tile).
            pl.BlockSpec(memory_space=pltpu.MemorySpace.SMEM),
        ],
        out_specs=pl.BlockSpec((tb, 1), lambda i: (i, 0)),
        compiler_params=pltpu.CompilerParams(
            dimension_semantics=("parallel",),
            vmem_limit_bytes=vmem_limit),
    )(x, w1p, b1p, w2p, b2s)

    return out


def init_params(key, input_size, hidden_size):
    """Deterministic init mimicking torch.nn.Linear default (U(-1/sqrt(fan_in), +))."""
    in_dim = input_size * 2
    k1, k2, k3, k4 = jax.random.split(key, 4)
    bound1 = 1.0 / jnp.sqrt(in_dim)
    w1 = jax.random.uniform(k1, (in_dim, hidden_size), jnp.float32, -bound1, bound1)
    b1 = jax.random.uniform(k2, (1, hidden_size), jnp.float32, -bound1, bound1)
    bound2 = 1.0 / jnp.sqrt(hidden_size)
    w2 = jax.random.uniform(k3, (hidden_size, 1), jnp.float32, -bound2, bound2)
    b2 = jax.random.uniform(k4, (1, 1), jnp.float32, -bound2, bound2)
    return w1, b1, w2, b2


def _reference(x, w1, b1, w2, b2):
    return jax.nn.sigmoid(jnp.maximum(x @ w1 + b1, 0.0) @ w2 + b2)


if __name__ == "__main__":
    key = jax.random.PRNGKey(0)

    # Config 1: awkward shapes (D=32, H=32, B=200) -> unpadded feature dim,
    # 2 grid steps (tb=104) with a partial, grid-masked last batch tile.
    input_size, hidden_size, batch = 16, 32, 200
    kx, kp, key = jax.random.split(key, 3)
    x = jax.random.normal(kx, (batch, input_size * 2), dtype=jnp.float32)
    w1, b1, w2, b2 = init_params(kp, input_size, hidden_size)
    out = jax.block_until_ready(ffnn_forward(x, w1, b1, w2, b2))
    ref = _reference(x, w1, b1, w2, b2)
    assert out.shape == (batch, 1)
    assert jnp.allclose(out, ref, atol=1e-5, rtol=1e-5)

    # Config 2: lane-aligned shapes (D=H=128, B=512) -> 2 grid steps of 256
    # rows (both TensorCores busy on v7x), VMEM-resident weights.
    input_size, hidden_size, batch = 64, 128, 512
    kx, kp, key = jax.random.split(key, 3)
    x = jax.random.normal(kx, (batch, input_size * 2), dtype=jnp.float32)
    w1, b1, w2, b2 = init_params(kp, input_size, hidden_size)
    out = jax.block_until_ready(ffnn_forward(x, w1, b1, w2, b2))
    ref = _reference(x, w1, b1, w2, b2)
    assert out.shape == (batch, 1)
    assert jnp.allclose(out, ref, atol=1e-5, rtol=1e-5)

    # Config 3: bf16-streamed x + bf16 MXU operands (f32 accumulate),
    # 16-row sublane alignment, partial last tile.
    input_size, hidden_size, batch = 32, 96, 1000
    kx, kp, key = jax.random.split(key, 3)
    x16 = jax.random.normal(kx, (batch, input_size * 2),
                            dtype=jnp.float32).astype(jnp.bfloat16)
    w1, b1, w2, b2 = init_params(kp, input_size, hidden_size)
    out = jax.block_until_ready(
        ffnn_forward(x16, w1, b1, w2, b2, matmul_dtype=jnp.bfloat16))
    ref = _reference(x16.astype(jnp.float32), w1, b1, w2, b2)
    assert out.shape == (batch, 1)
    assert jnp.allclose(out, ref, atol=2e-2, rtol=2e-2)

    # Config 4: hidden_size == 0 branch (single Linear -> Sigmoid).
    input_size, batch = 8, 64
    kx, kw, kb = jax.random.split(key, 3)
    bound = 1.0 / jnp.sqrt(input_size * 2)
    w = jax.random.uniform(kw, (input_size * 2, 1), jnp.float32, -bound, bound)
    b = jax.random.uniform(kb, (1, 1), jnp.float32, -bound, bound)
    x = jax.random.normal(kx, (batch, input_size * 2), dtype=jnp.float32)
    out = jax.block_until_ready(ffnn_forward(x, w, b))
    ref = jax.nn.sigmoid(x @ w + b)
    assert out.shape == (batch, 1)
    assert jnp.allclose(out, ref, atol=1e-5, rtol=1e-5)

    print("KERNEL_OK")
</pallas_src>

<mosaic_0001>
module attributes {stable_mosaic.version = 11 : i64} {
  func.func @ffnn_kernel(%arg0: i32, %arg1: memref<104x32xf32, #tpu.memory_space<vmem>>, %arg2: memref<32x128xf32, #tpu.memory_space<vmem>>, %arg3: memref<1x128xf32, #tpu.memory_space<vmem>>, %arg4: memref<1x128xf32, #tpu.memory_space<vmem>>, %arg5: memref<1x1xf32, #tpu.memory_space<smem>>, %arg6: memref<104x1xf32, #tpu.memory_space<vmem>>) attributes {dimension_semantics = [#tpu.dimension_semantics<parallel>], iteration_bounds = array<i64: 2>, scalar_prefetch = 0 : i64, scratch_operands = 0 : i64, tpu.core_type = #tpu.core_type<tc>, window_params = [{transform_indices = @transform_0, window_bounds = array<i64: 104, 32>}, {pipeline_mode = #tpu.pipeline_mode<synchronous>, transform_indices = @transform_1, window_bounds = array<i64: 32, 128>}, {pipeline_mode = #tpu.pipeline_mode<synchronous>, transform_indices = @transform_2, window_bounds = array<i64: 1, 128>}, {pipeline_mode = #tpu.pipeline_mode<synchronous>, transform_indices = @transform_3, window_bounds = array<i64: 1, 128>}, {transform_indices = @transform_4, window_bounds = array<i64: 1, 1>}, {transform_indices = @transform_5, window_bounds = array<i64: 104, 1>}]} {
    %c0 = arith.constant 0 : index
    %c0_0 = arith.constant 0 : index
    %0 = vector.load %arg1[%c0, %c0_0] : memref<104x32xf32, #tpu.memory_space<vmem>>, vector<104x32xf32>
    %c0_1 = arith.constant 0 : index
    %c0_2 = arith.constant 0 : index
    %1 = vector.load %arg2[%c0_1, %c0_2] : memref<32x128xf32, #tpu.memory_space<vmem>>, vector<32x128xf32>
    %cst = arith.constant dense<0.000000e+00> : vector<104x128xf32>
    %2 = tpu.matmul %0, %1, %cst {dimension_numbers = #tpu.dot_dimension_numbers<[1], [0], [0], [1], [0, 0, 1, 1], [], []>} : vector<104x32xf32>, vector<32x128xf32>, vector<104x128xf32> -> vector<104x128xf32>
    %c0_3 = arith.constant 0 : index
    %c0_4 = arith.constant 0 : index
    %3 = vector.load %arg3[%c0_3, %c0_4] : memref<1x128xf32, #tpu.memory_space<vmem>>, vector<1x128xf32>
    %4 = vector.broadcast %3 : vector<1x128xf32> to vector<104x128xf32>
    %5 = arith.addf %2, %4 : vector<104x128xf32>
    %cst_5 = arith.constant 0.000000e+00 : f32
    %6 = vector.broadcast %cst_5 : f32 to vector<104x128xf32>
    %7 = arith.maximumf %5, %6 : vector<104x128xf32>
    %c0_6 = arith.constant 0 : index
    %c0_7 = arith.constant 0 : index
    %8 = vector.load %arg4[%c0_6, %c0_7] : memref<1x128xf32, #tpu.memory_space<vmem>>, vector<1x128xf32>
    %9 = vector.broadcast %8 : vector<1x128xf32> to vector<104x128xf32>
    %10 = arith.mulf %7, %9 : vector<104x128xf32>
    %cst_8 = arith.constant dense<0.000000e+00> : vector<104xf32>
    %11 = vector.multi_reduction <add>, %10, %cst_8 [1] : vector<104x128xf32> to vector<104xf32>
    %12 = vector.shape_cast %11 : vector<104xf32> to vector<104x1xf32>
    %c0_9 = arith.constant 0 : index
    %c0_10 = arith.constant 0 : index
    %13 = memref.load %arg5[%c0_9, %c0_10] : memref<1x1xf32, #tpu.memory_space<smem>>
    %14 = vector.broadcast %13 : f32 to vector<104x1xf32>
    %15 = arith.addf %12, %14 : vector<104x1xf32>
    %16 = arith.negf %15 : vector<104x1xf32>
    %17 = math.exp %16 : vector<104x1xf32>
    %cst_11 = arith.constant 1.000000e+00 : f32
    %18 = vector.broadcast %cst_11 : f32 to vector<104x1xf32>
    %19 = arith.addf %18, %17 : vector<104x1xf32>
    %20 = arith.divf %18, %19 : vector<104x1xf32>
    %c0_12 = arith.constant 0 : index
    %c0_13 = arith.constant 0 : index
    %21 = vector.load %arg6[%c0_12, %c0_13] : memref<104x1xf32, #tpu.memory_space<vmem>>, vector<104x1xf32>
    tpu.vector_store %arg6[%c0_12, %c0_13], %20 {strides = array<i32>} : memref<104x1xf32, #tpu.memory_space<vmem>>, vector<104x1xf32>,
    return
  }
  func.func @transform_0(%arg0: i32) -> (i32, i32) {
    %c0_i32 = arith.constant 0 : i32
    %c0_i32_0 = arith.constant 0 : i32
    return %arg0, %c0_i32 : i32, i32
  }
  func.func @transform_1(%arg0: i32) -> (i32, i32) {
    %c0_i32 = arith.constant 0 : i32
    %c0_i32_0 = arith.constant 0 : i32
    %c0_i32_1 = arith.constant 0 : i32
    return %c0_i32, %c0_i32_0 : i32, i32
  }
  func.func @transform_2(%arg0: i32) -> (i32, i32) {
    %c0_i32 = arith.constant 0 : i32
    %c0_i32_0 = arith.constant 0 : i32
    %c0_i32_1 = arith.constant 0 : i32
    return %c0_i32, %c0_i32_0 : i32, i32
  }
  func.func @transform_3(%arg0: i32) -> (i32, i32) {
    %c0_i32 = arith.constant 0 : i32
    %c0_i32_0 = arith.constant 0 : i32
    %c0_i32_1 = arith.constant 0 : i32
    return %c0_i32, %c0_i32_0 : i32, i32
  }
  func.func @transform_4(%arg0: i32) -> (i32, i32) {
    %c0_i32 = arith.constant 0 : i32
    %c0_i32_0 = arith.constant 0 : i32
    %c0_i32_1 = arith.constant 0 : i32
    return %c0_i32, %c0_i32_0 : i32, i32
  }
  func.func @transform_5(%arg0: i32) -> (i32, i32) {
    %c0_i32 = arith.constant 0 : i32
    %c0_i32_0 = arith.constant 0 : i32
    return %arg0, %c0_i32 : i32, i32
  }
}

</mosaic_0001>

<bundles_post_ra>
// kernel: tpu_custom_call.1
= control target key start
LH: loop header
LB: loop body
LE: loop exit
PB: predicated region body
PF: predicated region fallthrough
CT: control target
= control target key end

     0   :  { %s1524_s0 = inlined_call_operand.vmem [shape: f32[200,32], index: 0, kind: input, shape index: {}]   ;;  %s1525_s1 = inlined_call_operand.vmem [shape: f32[32,128], index: 1, kind: input, shape index: {}]   ;;  %s1526_s2 = inlined_call_operand.vmem [shape: f32[1,128], index: 2, kind: input, shape index: {}]   ;;  %s1527_s3 = inlined_call_operand.vmem [shape: f32[1,128], index: 3, kind: input, shape index: {}]   ;;  %s1528_s4 = inlined_call_operand.<no memory space> [shape: f32[1,1], index: 4, kind: input, shape index: {}]   ;;  %s1529_s5 = inlined_call_operand.vmem [shape: f32[200,1], index: 5, kind: output, shape index: {}]  }
   0x1   :  { %10 = sst [smem:[#allocation2]] %s1528_s4 }
   0x2   :  { %s1265_s20 = smov 0   ;;  %s1267_s21 = smov 0  }
   0x3   :  { %s1269_s22 = smov 0  }
   0x4 LB: > { %s1278_s4 = sadd.s32 4294967295, %s1195_s22   ;;  %s1280_s23 = sadd.s32 1, %s1195_s22   ;;  %s1195_s22 = sphi %s1269_s22, %s1536_s22   ;;  %s1191_s21 = sphi %s1267_s21, %s1535_s21   ;;  %s1187_s20 = sphi %s1265_s20, %s1534_s20  }
   0x5   : > { %s130_s24 = ssub.s32 %s1195_s22, %s1280_s23  ;;  %s133_s25 = sadd.s32 1, %s1191_s21 }
   0x6   : > { %p131_p0 = scmp.eq.s32.totalorder %s130_s24, 0  ;;  %p143_p1 = scmp.ne.s32.totalorder %s1191_s21, %s1187_s20 }
   0x7   : > { %p144_p2 = scmp.eq.s32.totalorder %s1278_s4, 1  ;;  %p875_p3 = scmp.ge.s32.totalorder %s1195_s22, 1 }
   0x8   : > { %s1288_s26 = scalar_select %p131_p0, %s1191_s21, %s133_s25  }
   0x9   : > { %p1290_p4 = por %p144_p2, %p143_p1  ;;  %p197_p5 = scmp.lt.s32.totalorder %s1195_s22, 3 }
   0xb   : > { %p198_p6 = pnand %p875_p3, %p197_p5 }
   0xc   : > { %v260_v0 = vld [vmem:[%s1525_s1] sm:$0xff] (!%p198_p6)  ;;  %v261_v1 = vld [vmem:[%s1525_s1 + $0x8] sm:$0xff] (!%p198_p6)  ;;  %v262_v2 = vld [vmem:[%s1525_s1 + $0x10] sm:$0xff] (!%p198_p6)  ;;  %v1229_v3 = vmov (!%p198_p6), 0.0|0.0   ;;  %s1307_s11 = smul.u32 (!%p198_p6), 13, %s1278_s4  ;;  %vm1230_vm0 = vmmov (!%p198_p6), 0  }
   0xd   : > { %201 = sbr.rel (%p198_p6) target bundleno = 505 (0x1f9), region = 40  ;;  %982 = vmatprep.subr.bf16.mxu0 (!%p198_p6), %v1229_v3  ;;  %988 = vmatprep.subr.bf16.mxu1 (!%p198_p6), %v1229_v3  ;;  %v983_v4 = vpack.c.bf16 (!%p198_p6), %v261_v1, %v260_v0  ;;  %v263_v5 = vld [vmem:[%s1525_s1 + $0x18] sm:$0xff] (!%p198_p6)  ;;  %v1231_v6 = vmov (!%p198_p6), 0.0   ;;  %vm271_vm1 = vcmask (!%p198_p6), 261120   ;;  %v1358_v21 = vld [vmem:[%s1526_s2] ss:$0 sm:$0xff] (!%p198_p6) }
   0xe   : > { %943 = vmatprep.mubr.msk.f32.mxu0 (!%p198_p6), %vm1230_vm0, %v1231_v6  ;;  %964 = vmatprep.mubr.msk.f32.mxu1 (!%p198_p6), %vm1230_vm0, %v1231_v6  ;;  %v986_v7 = vpack.c.bf16 (!%p198_p6), %v263_v5, %v262_v2  ;;  %p233_p7 = scmp.lt.s32.totalorder (!%p198_p6), %s1307_s11, 24  ;;  %v1365_v28 = vld [vmem:[%s1527_s3] ss:$0 sm:$0xff] (!%p198_p6)  ;;  %s500_s24 = sld [smem:[#allocation2]] (!%p198_p6)  ;;  %vm593_vm2 = vcmask (!%p198_p6), 7168  }
   0xf   : > { %984 = vmatpush3.bf16.msra.mxu0 (!%p198_p6), %v983_v4  ;;  %990 = vmatpush3.bf16.msra.mxu1 (!%p198_p6), %v983_v4  ;;  %s225_s25 = sand.u32 (!%p198_p6), 1, %s1187_s20  }
  0x10   : > { %985 = vmatprep.subr.bf16.mxu0 (!%p198_p6), %v1229_v3  ;;  %989 = vmatprep.subr.bf16.mxu1 (!%p198_p6), %v1229_v3  ;;  %s992_s28 = smul.u32 (!%p198_p6), 104, %s225_s25 }
  0x12   : > { %s1406_s20 = scalar_lea.vmem (!%p198_p6), [#allocation3], %s992_s28  }
  0x13   : > { %987 = vmatpush3.bf16.msra.mxu0 (!%p198_p6), %v986_v7  ;;  %991 = vmatpush3.bf16.msra.mxu1 (!%p198_p6), %v986_v7 }
  0x14   : > { %s234_s12 = scalar_select %p233_p7, %s1307_s11, 24 }
  0x15   : > { %s615_s29 = ssub.s32 (%p1290_p4), 25, %s1307_s11  ;;  %s917_s30 = smul.u32 (%p1290_p4), 104, %s1278_s4 }
  0x16   : > { %s876_s13 = sshll.u32 %s234_s12, 3  ;;  %p616_p8 = scmp.lt.s32.totalorder (%p1290_p4), %s615_s29, 13 }
  0x17   : > { %s1316_s16 = scalar_lea.vmem %s1524_s0, %s876_s13  ;;  %s1442_s8 = scalar_lea.vmem (%p1290_p4), %s1529_s5, %s917_s30  }
  0x18   : > { %v247_v8 = vld [vmem:[%s1316_s16] sm:$0xff]  ;;  %v254_v9 = vld [vmem:[%s1316_s16 + $0x38] sm:$0xff]  ;;  %v248_v10 = vld [vmem:[%s1316_s16 + $0x8] sm:$0xff] }
  0x19   : > { %944 = vmatmul.mubr.msk.f32.vlgmr.msra.gmra.mrb[0].mxu0 %vm271_vm1, %v247_v8  ;;  %965 = vmatmul.mubr.msk.f32.vlgmr.msra.gmra.mrb[0].mxu1 %vm271_vm1, %v254_v9  ;;  %v255_v11 = vld [vmem:[%s1316_s16 + $0x40] sm:$0xff]  ;;  %v249_v12 = vld [vmem:[%s1316_s16 + $0x10] sm:$0xff]  ;;  %v256_v13 = vld [vmem:[%s1316_s16 + $0x48] sm:$0xff] }
  0x1a   : > { %946 = vmatprep.mubr.msk.f32.mxu0 %vm1230_vm0, %v1231_v6  ;;  %967 = vmatprep.mubr.msk.f32.mxu1 %vm1230_vm0, %v1231_v6  ;;  %v250_v14 = vld [vmem:[%s1316_s16 + $0x18] sm:$0xff]  ;;  %v257_v15 = vld [vmem:[%s1316_s16 + $0x50] sm:$0xff]  ;;  %v251_v16 = vld [vmem:[%s1316_s16 + $0x20] sm:$0xff] }
  0x1b   : > { %v258_v17 = vld [vmem:[%s1316_s16 + $0x58] sm:$0xff]  ;;  %v252_v18 = vld [vmem:[%s1316_s16 + $0x28] sm:$0xff]  ;;  %v259_v19 = vld [vmem:[%s1316_s16 + $0x60] sm:$0xff] }
  0x1c   : > { %v253_v20 = vld [vmem:[%s1316_s16 + $0x30] sm:$0xff] }
  0x1d   : > { %947 = vmatmul.mubr.msk.f32.gmra.mrb[2].mxu0 %vm271_vm1, %v248_v10  ;;  %968 = vmatmul.mubr.msk.f32.gmra.mrb[2].mxu1 %vm271_vm1, %v255_v11 }
  0x1e   : > { %949 = vmatprep.mubr.msk.f32.mxu0 %vm1230_vm0, %v1231_v6  ;;  %970 = vmatprep.mubr.msk.f32.mxu1 %vm1230_vm0, %v1231_v6 }
  0x21   : > { %950 = vmatmul.mubr.msk.f32.gmra.mrb[4].mxu0 %vm271_vm1, %v249_v12  ;;  %971 = vmatmul.mubr.msk.f32.gmra.mrb[4].mxu1 %vm271_vm1, %v256_v13 }
  0x22   : > { %952 = vmatprep.mubr.msk.f32.mxu0 %vm1230_vm0, %v1231_v6  ;;  %973 = vmatprep.mubr.msk.f32.mxu1 %vm1230_vm0, %v1231_v6 }
  0x25   : > { %953 = vmatmul.mubr.msk.f32.gmra.mrb[6].mxu0 %vm271_vm1, %v250_v14  ;;  %974 = vmatmul.mubr.msk.f32.gmra.mrb[6].mxu1 %vm271_vm1, %v257_v15 }
  0x26   : > { %955 = vmatprep.mubr.msk.f32.mxu0 %vm1230_vm0, %v1231_v6  ;;  %976 = vmatprep.mubr.msk.f32.mxu1 %vm1230_vm0, %v1231_v6 }
  0x29   : > { %956 = vmatmul.mubr.msk.f32.gmra.mrb[8].mxu0 %vm271_vm1, %v251_v16  ;;  %977 = vmatmul.mubr.msk.f32.gmra.mrb[8].mxu1 %vm271_vm1, %v258_v17 }
  0x2a   : > { %958 = vmatprep.mubr.msk.f32.mxu0 %vm1230_vm0, %v1231_v6  ;;  %979 = vmatprep.mubr.msk.f32.mxu1 %vm1230_vm0, %v1231_v6 }
  0x2d   : > { %959 = vmatmul.mubr.msk.f32.gmra.mrb[10].mxu0 %vm271_vm1, %v252_v18  ;;  %980 = vmatmul.mubr.msk.f32.gmra.mrb[10].mxu1 %vm271_vm1, %v259_v19 }
  0x2e   : > { %961 = vmatprep.mubr.msk.f32.mxu0 %vm1230_vm0, %v1231_v6 }
  0x31   : > { %962 = vmatmul.mubr.msk.f32.gmra.mrb[12].mxu0 %vm271_vm1, %v253_v20 }
  0xec   : > { %v377_v22 = vpop.f32.mrb[0].mxu0  ;;  %v412_v23 = vpop.f32.mrb[0].mxu1 }
  0xed   : > { %v378_v24 = vadd.f32 %v1358_v21, %v377_v22  ;;  %v945_v25 = vpop.f32.mrb[1].mxu0  ;;  %v413_v26 = vadd.f32 %v1358_v21, %v412_v23  ;;  %v966_v27 = vpop.f32.mrb[1].mxu1 }
  0xee   : > { %v1391_v25 = vstv %s500_s24 }
  0xef   : > { %v441_v29 = vmax.f32 %v378_v24, 0.0  ;;  %v448_v30 = vmax.f32 %v413_v26, 0.0 }
  0xf0   : > { %v382_v31 = vpop.f32.mrb[2].mxu0  ;;  %v417_v32 = vpop.f32.mrb[2].mxu1 }
  0xf1   : > { %v383_v33 = vadd.f32 %v1358_v21, %v382_v31  ;;  %v948_v34 = vpop.f32.mrb[3].mxu0  ;;  %v418_v35 = vadd.f32 %v1358_v21, %v417_v32  ;;  %v461_v36 = vmul.f32 %v1365_v28, %v441_v29  ;;  %v969_v37 = vpop.f32.mrb[3].mxu1  ;;  %v468_v38 = vmul.f32 %v1365_v28, %v448_v30 }
  0xf3   : > { %v442_v39 = vmax.f32 %v383_v33, 0.0  ;;  %v449_v40 = vmax.f32 %v418_v35, 0.0  ;;  %474 = vadd.xlane.f32.xlu0 %v461_v36  ;;  %488 = vadd.xlane.f32.xlu1 %v468_v38 }
  0xf4   : > { %v387_v41 = vpop.f32.mrb[4].mxu0  ;;  %v422_v42 = vpop.f32.mrb[4].mxu1 }
  0xf5   : > { %v388_v43 = vadd.f32 %v1358_v21, %v387_v41  ;;  %v951_v44 = vpop.f32.mrb[5].mxu0  ;;  %v423_v45 = vadd.f32 %v1358_v21, %v422_v42  ;;  %v972_v46 = vpop.f32.mrb[5].mxu1  ;;  %v462_v47 = vmul.f32 %v1365_v28, %v442_v39  ;;  %v469_v50 = vmul.f32 %v1365_v28, %v449_v40 }
  0xf7   : > { %v443_v48 = vmax.f32 %v388_v43, 0.0  ;;  %v450_v49 = vmax.f32 %v423_v45, 0.0  ;;  %476 = vadd.xlane.f32.xlu0 %v462_v47 }
  0xf8   : > { %v392_v51 = vpop.f32.mrb[6].mxu0  ;;  %v427_v52 = vpop.f32.mrb[6].mxu1 }
  0xf9   : > { %v393_v53 = vadd.f32 %v1358_v21, %v392_v51  ;;  %v428_v54 = vadd.f32 %v1358_v21, %v427_v52  ;;  %v954_v55 = vpop.f32.mrb[7].mxu0  ;;  %v463_v56 = vmul.f32 %v1365_v28, %v443_v48  ;;  %v975_v57 = vpop.f32.mrb[7].mxu1  ;;  %v470_v59 = vmul.f32 %v1365_v28, %v450_v49 }
  0xfb   : > { %v451_v58 = vmax.f32 %v428_v54, 0.0  ;;  %490 = vadd.xlane.f32.xlu0 %v469_v50  ;;  %478 = vadd.xlane.f32.xlu1 %v463_v56  ;;  %v444_v62 = vmax.f32 %v393_v53, 0.0 }
  0xfc   : > { %v397_v60 = vpop.f32.mrb[8].mxu0  ;;  %v432_v61 = vpop.f32.mrb[8].mxu1 }
  0xfd   : > { %v398_v63 = vadd.f32 %v1358_v21, %v397_v60  ;;  %v957_v0 = vpop.f32.mrb[9].mxu0  ;;  %v471_v1 = vmul.f32 %v1365_v28, %v451_v58  ;;  %v978_v2 = vpop.f32.mrb[9].mxu1  ;;  %v433_v4 = vadd.f32 %v1358_v21, %v432_v61  ;;  %v464_v9 = vmul.f32 %v1365_v28, %v444_v62 }
  0xff   : > { %v445_v3 = vmax.f32 %v398_v63, 0.0  ;;  %494 = vadd.xlane.f32.xlu0 %v471_v1  ;;  %492 = vadd.xlane.f32.xlu1 %v470_v59  ;;  %v452_v13 = vmax.f32 %v433_v4, 0.0 }
 0x100   : > { %v402_v5 = vpop.f32.mrb[10].mxu0  ;;  %v437_v6 = vpop.f32.mrb[10].mxu1 }
 0x101   : > { %v403_v7 = vadd.f32 %v1358_v21, %v402_v5  ;;  %v960_v8 = vpop.f32.mrb[11].mxu0  ;;  %v465_v10 = vmul.f32 %v1365_v28, %v445_v3  ;;  %v981_v11 = vpop.f32.mrb[11].mxu1  ;;  %v438_v14 = vadd.f32 %v1358_v21, %v437_v6  ;;  %v472_v22 = vmul.f32 %v1365_v28, %v452_v13 }
 0x103   : > { %v446_v12 = vmax.f32 %v403_v7, 0.0  ;;  %480 = vadd.xlane.f32.xlu1 %v464_v9  ;;  %482 = vadd.xlane.f32.xlu0 %v465_v10  ;;  %v453_v20 = vmax.f32 %v438_v14, 0.0 }
 0x104   : > { %v407_v15 = vpop.f32.mrb[12].mxu0 }
 0x105   : > { %v408_v16 = vadd.f32 %v1358_v21, %v407_v15  ;;  %v963_v17 = vpop.f32.mrb[13].mxu0  ;;  %v466_v18 = vmul.f32 %v1365_v28, %v446_v12  ;;  %v473_v24 = vmul.f32 %v1365_v28, %v453_v20 }
 0x107   : > { %v447_v19 = vmax.f32 %v408_v16, 0.0  ;;  %484 = vadd.xlane.f32.xlu1 %v466_v18 }
 0x109   : > { %v467_v23 = vmul.f32 %v1365_v28, %v447_v19 }
 0x10b   : > { %496 = vadd.xlane.f32.xlu1 %v472_v22  ;;  %486 = vadd.xlane.f32.xlu0 %v467_v23 }
 0x10f   : > { %498 = vadd.xlane.f32.xlu0 %v473_v24 }
 0x180   : > { %v475_v26 = vpop.xlane.xlu0 %474  ;;  %v489_v21 = vpop.xlane.xlu1 %488 }
 0x181   : > { %v502_v27 = vadd.f32 %v1391_v25, %v475_v26  ;;  %v509_v29 = vadd.f32 %v1391_v25, %v489_v21 }
 0x183   : > { %v892_v30 = vmul.f32 -1.442695, %v502_v27  ;;  %v899_v31 = vmul.f32 -1.442695, %v509_v29 }
 0x184   : > { %v477_v32 = vpop.xlane.xlu0 %476 }
 0x185   : > { %1085 = vpow2.f32 %v892_v30  ;;  %v503_v33 = vadd.f32 %v1391_v25, %v477_v32 }
 0x186   : > { %1087 = vpow2.f32 %v899_v31 }
 0x187   : > { %v893_v34 = vmul.f32 -1.442695, %v503_v33 }
 0x188   : > { %v491_v35 = vpop.xlane.xlu0 %490  ;;  %v479_v28 = vpop.xlane.xlu1 %478 }
 0x189   : > { %1089 = vpow2.f32 %v893_v34  ;;  %v510_v36 = vadd.f32 %v1391_v25, %v491_v35  ;;  %v504_v37 = vadd.f32 %v1391_v25, %v479_v28 }
 0x18b   : > { %v900_v38 = vmul.f32 -1.442695, %v510_v36  ;;  %v894_v39 = vmul.f32 -1.442695, %v504_v37 }
 0x18c   : > { %v495_v40 = vpop.xlane.xlu0 %494  ;;  %v493_v41 = vpop.xlane.xlu1 %492 }
 0x18d   : > { %1091 = vpow2.f32 %v900_v38  ;;  %v512_v42 = vadd.f32 %v1391_v25, %v495_v40  ;;  %v511_v43 = vadd.f32 %v1391_v25, %v493_v41 }
 0x18e   : > { %1093 = vpow2.f32 %v894_v39 }
 0x18f   : > { %v1086_v44 = vpop.eup %1085  ;;  %v902_v45 = vmul.f32 -1.442695, %v512_v42  ;;  %v901_v48 = vmul.f32 -1.442695, %v511_v43 }
 0x190   : > { %v1088_v46 = vpop.eup %1087  ;;  %v554_v47 = vadd.f32 1.0, %v1086_v44  ;;  %v481_v49 = vpop.xlane.xlu1 %480 }
 0x191   : > { %v483_v50 = vpop.xlane.xlu0 %482  ;;  %v561_v51 = vadd.f32 1.0, %v1088_v46  ;;  %1095 = vpow2.f32 %v902_v45  ;;  %v505_v52 = vadd.f32 %v1391_v25, %v481_v49 }
 0x192   : > { %v506_v53 = vadd.f32 %v1391_v25, %v483_v50  ;;  %1097 = vrcp.f32 %v554_v47 }
 0x193   : > { %v1090_v54 = vpop.eup %1089  ;;  %1099 = vrcp.f32 %v561_v51  ;;  %v895_v55 = vmul.f32 -1.442695, %v505_v52 }
 0x194   : > { %v896_v56 = vmul.f32 -1.442695, %v506_v53  ;;  %v555_v57 = vadd.f32 1.0, %v1090_v54  ;;  %1101 = vpow2.f32 %v901_v48  ;;  %v485_v58 = vpop.xlane.xlu1 %484 }
 0x195   : > { %1103 = vpow2.f32 %v895_v55  ;;  %v507_v59 = vadd.f32 %v1391_v25, %v485_v58 }
 0x196   : > { %1105 = vrcp.f32 %v555_v57 }
 0x197   : > { %v1092_v60 = vpop.eup %1091  ;;  %1107 = vpow2.f32 %v896_v56  ;;  %v897_v61 = vmul.f32 -1.442695, %v507_v59 }
 0x198   : > { %v1094_v62 = vpop.eup %1093  ;;  %v562_v63 = vadd.f32 1.0, %v1092_v60  ;;  %v497_v0 = vpop.xlane.xlu1 %496 }
 0x199   : > { %v487_v1 = vpop.xlane.xlu0 %486  ;;  %v556_v2 = vadd.f32 1.0, %v1094_v62  ;;  %1109 = vpow2.f32 %v897_v61  ;;  %v513_v3 = vadd.f32 %v1391_v25, %v497_v0 }
 0x19a   : > { %v508_v4 = vadd.f32 %v1391_v25, %v487_v1  ;;  %1111 = vrcp.f32 %v562_v63 }
 0x19b   : > { %v1096_v5 = vpop.eup %1095  ;;  %1113 = vrcp.f32 %v556_v2  ;;  %v903_v6 = vmul.f32 -1.442695, %v513_v3 }
 0x19c   : > { %v898_v7 = vmul.f32 -1.442695, %v508_v4  ;;  %v1098_v8 = vpop.eup %1097  ;;  %v564_v9 = vadd.f32 1.0, %v1096_v5 }
 0x19d   : > { %v499_v10 = vpop.xlane.xlu0 %498  ;;  %v1100_v11 = vpop.eup %1099  ;;  %594 = vst.msk [vmem:[%s1406_s20] sm:$0xff] %vm593_vm2, %v1098_v8  ;;  %1115 = vpow2.f32 %v903_v6 }
 0x19e   : > { %v514_v12 = vadd.f32 %v1391_v25, %v499_v10  ;;  %v1102_v13 = vpop.eup %1101  ;;  %601 = vst.msk [vmem:[%s1406_s20 + $0x38] sm:$0xff] %vm593_vm2, %v1100_v11  ;;  %1117 = vrcp.f32 %v564_v9 }
 0x19f   : > { %v1104_v14 = vpop.eup %1103  ;;  %v563_v15 = vadd.f32 1.0, %v1102_v13  ;;  %1119 = vpow2.f32 %v898_v7 }
 0x1a0   : > { %v904_v16 = vmul.f32 -1.442695, %v514_v12  ;;  %v1106_v17 = vpop.eup %1105  ;;  %v557_v18 = vadd.f32 1.0, %v1104_v14 }
 0x1a1   : > { %v1108_v19 = vpop.eup %1107  ;;  %595 = vst.msk [vmem:[%s1406_s20 + $0x8] sm:$0xff] %vm593_vm2, %v1106_v17  ;;  %1121 = vrcp.f32 %v563_v15 }
 0x1a2   : > { %1123 = vrcp.f32 %v557_v18  ;;  %v558_v20 = vadd.f32 1.0, %v1108_v19 }
 0x1a3   : > { %v1110_v22 = vpop.eup %1109  ;;  %1125 = vpow2.f32 %v904_v16 }
 0x1a4   : > { %v1112_v23 = vpop.eup %1111  ;;  %1127 = vrcp.f32 %v558_v20  ;;  %v559_v24 = vadd.f32 1.0, %v1110_v22 }
 0x1a5   : > { %v1114_v25 = vpop.eup %1113  ;;  %602 = vst.msk [vmem:[%s1406_s20 + $0x40] sm:$0xff] %vm593_vm2, %v1112_v23 }
 0x1a6   : > { %596 = vst.msk [vmem:[%s1406_s20 + $0x10] sm:$0xff] %vm593_vm2, %v1114_v25  ;;  %1129 = vrcp.f32 %v559_v24 }
 0x1a7   : > { %v1116_v26 = vpop.eup %1115 }
 0x1a8   : > { %v1118_v21 = vpop.eup %1117  ;;  %v565_v27 = vadd.f32 1.0, %v1116_v26 }
 0x1a9   : > { %v1120_v29 = vpop.eup %1119  ;;  %604 = vst.msk [vmem:[%s1406_s20 + $0x50] sm:$0xff] %vm593_vm2, %v1118_v21 }
 0x1aa   : > { %1131 = vrcp.f32 %v565_v27  ;;  %v560_v30 = vadd.f32 1.0, %v1120_v29 }
 0x1ab   : > { %v1122_v31 = vpop.eup %1121 }
 0x1ac   : > { %v1124_v32 = vpop.eup %1123  ;;  %603 = vst.msk [vmem:[%s1406_s20 + $0x48] sm:$0xff] %vm593_vm2, %v1122_v31  ;;  %1133 = vrcp.f32 %v560_v30 }
 0x1ad   : > { %v1126_v33 = vpop.eup %1125  ;;  %597 = vst.msk [vmem:[%s1406_s20 + $0x18] sm:$0xff] %vm593_vm2, %v1124_v32 }
 0x1ae   : > { %v1128_v34 = vpop.eup %1127  ;;  %v566_v35 = vadd.f32 1.0, %v1126_v33 }
 0x1af   : > { %598 = vst.msk [vmem:[%s1406_s20 + $0x20] sm:$0xff] %vm593_vm2, %v1128_v34 }
 0x1b0   : > { %v1130_v28 = vpop.eup %1129  ;;  %1135 = vrcp.f32 %v566_v35 }
 0x1b1   : > { %599 = vst.msk [vmem:[%s1406_s20 + $0x28] sm:$0xff] %vm593_vm2, %v1130_v28 }
 0x1b4   : > { %v1132_v36 = vpop.eup %1131 }
 0x1b5   : > { %605 = vst.msk [vmem:[%s1406_s20 + $0x58] sm:$0xff] %vm593_vm2, %v1132_v36  ;;  %613 = sbr.rel (!%p1290_p4) target bundleno = 505 (0x1f9), region = 44 }
 0x1b6   : > { %v1134_v37 = vpop.eup %1133 }
 0x1b7   : > { %600 = vst.msk [vmem:[%s1406_s20 + $0x30] sm:$0xff] %vm593_vm2, %v1134_v37 }
 0x1ba   : > { %v1136_v38 = vpop.eup %1135 }
 0x1bb   : > { %606 = vst.msk [vmem:[%s1406_s20 + $0x60] sm:$0xff] %vm593_vm2, %v1136_v38 }
 0x1bc   : > { %s1538_s29 = smov (!%p616_p8, %s615_s29), 13 }
 0x1bd   : > { %s905_s9 = sshll.u32 %s1538_s29, 7 }
 0x1be   : > { %p908_p9 = scmp.eq.s32.totalorder %s905_s9, 0 }
 0x1bf   : > { %1137 = sdivrem.u32 (!%p908_p9), %s1538_s29, 13 }
 0x1c0   : > { %624 = sbr.rel (%p908_p9) target bundleno = 505 (0x1f9), region = 48 }
 0x1c8   : > { %s1448_s27 = spop.drf %1137 }
 0x1c9   : > { %p909_p10 = scmp.le.s32.totalorder %s1448_s27, 0 }
 0x1ca   : > { %s1531_s4 = smov (!%p909_p10), %s1442_s8  ;;  %s1532_s10 = smov (!%p909_p10), %s1406_s20 }
 0x1cb   : > { %828 = sbr.rel (%p909_p10) target bundleno = 476 (0x1dc), region = 124  ;;  %s1457_s11 = smov (!%p909_p10), 0  }
 0x1cc   : > { %s1459_s12 = smov (!%p909_p10), 0  }
 0x1d2 LB: >> { %v712_v39 = vld [vmem:[%s1203_s10] sm:$0xff]  ;;  %v714_v40 = vld [vmem:[%s1203_s10 + $0x8] sm:$0xff]  ;;  %v716_v41 = vld [vmem:[%s1203_s10 + $0x10] sm:$0xff]  ;;  %s738_s13 = sadd.s32 1, %s1207_s11  ;;  %s706_s12 = sadd.s32 1, %s1211_s12   ;;  %s1211_s12 = sphi %s1459_s12, %s706_s12   ;;  %s1207_s11 = sphi %s1457_s11, %s1533_s11   ;;  %s1203_s10 = sphi %s1532_s10, %s743_s10   ;;  %s1199_s4 = sphi %s1531_s4, %s744_s4  }
 0x1d3   : >> { %713 = vst [vmem:[%s1199_s4] sm:$0xff] %v712_v39  ;;  %715 = vst [vmem:[%s1199_s4 + $0x8] sm:$0xff] %v714_v40  ;;  %v718_v42 = vld [vmem:[%s1203_s10 + $0x18] sm:$0xff]  ;;  %v720_v43 = vld [vmem:[%s1203_s10 + $0x20] sm:$0xff]  ;;  %p739_p11 = scmp.ge.s32.totalorder %s738_s13, %s1448_s27  ;;  %p705_p12 = scmp.ge.s32.totalorder %s706_s12, %s1448_s27 }
 0x1d4   : >> { %717 = vst [vmem:[%s1199_s4 + $0x10] sm:$0xff] %v716_v41  ;;  %v722_v44 = vld [vmem:[%s1203_s10 + $0x28] sm:$0xff]  ;;  %719 = vst [vmem:[%s1199_s4 + $0x18] sm:$0xff] %v718_v42  ;;  %v724_v45 = vld [vmem:[%s1203_s10 + $0x30] sm:$0xff] }
 0x1d5   : >> { %721 = vst [vmem:[%s1199_s4 + $0x20] sm:$0xff] %v720_v43  ;;  %723 = vst [vmem:[%s1199_s4 + $0x28] sm:$0xff] %v722_v44  ;;  %v726_v46 = vld [vmem:[%s1203_s10 + $0x38] sm:$0xff]  ;;  %v728_v47 = vld [vmem:[%s1203_s10 + $0x40] sm:$0xff]  ;;  %s1540_s13 = smov (%p739_p11, %s738_s13), 0  ;;  %708 = sbr.rel (!%p705_p12) target bundleno = 466 (0x1d2), region = 130 }
 0x1d6   : >> { %725 = vst [vmem:[%s1199_s4 + $0x30] sm:$0xff] %v724_v45  ;;  %727 = vst [vmem:[%s1199_s4 + $0x38] sm:$0xff] %v726_v46  ;;  %v730_v48 = vld [vmem:[%s1203_s10 + $0x48] sm:$0xff]  ;;  %v732_v49 = vld [vmem:[%s1203_s10 + $0x50] sm:$0xff]  ;;  %s741_s14 = smul.u32 104, %s1540_s13  ;;  %s1533_s11 = smov %s1540_s13 }
 0x1d7   : >> { %729 = vst [vmem:[%s1199_s4 + $0x40] sm:$0xff] %v728_v47  ;;  %v734_v50 = vld [vmem:[%s1203_s10 + $0x58] sm:$0xff]  ;;  %731 = vst [vmem:[%s1199_s4 + $0x48] sm:$0xff] %v730_v48  ;;  %v736_v51 = vld [vmem:[%s1203_s10 + $0x60] sm:$0xff] }
 0x1d8   : >> { %733 = vst [vmem:[%s1199_s4 + $0x50] sm:$0xff] %v732_v49  ;;  %735 = vst [vmem:[%s1199_s4 + $0x58] sm:$0xff] %v734_v50  ;;  %s743_s10 = scalar_lea.vmem %s1406_s20, %s741_s14 [#allocation3]  }
 0x1d9   : >> { %737 = vst [vmem:[%s1199_s4 + $0x60] sm:$0xff] %v736_v51  ;;  %s744_s4 = scalar_lea.vmem %s1442_s8, %s741_s14  }
 0x1dc PF: > { %1139 = sdivrem.u32 %s1538_s29, 13 }
 0x1dd   : > { %s910_s15 = smul.u32 104, %s1448_s27 }
 0x1df   : > { %s749_s16 = scalar_lea.vmem %s1406_s20, %s910_s15 [#allocation3]   ;;  %s751_s17 = scalar_lea.vmem %s1442_s8, %s910_s15  }
 0x1e5   : > { %s1140_s18 = spop.drf %1139 }
 0x1e6   : > { %p912_p13 = scmp.le.s32.totalorder %s1140_s18, 0 }
 0x1e7   : > { %s1213_s19 = smov (!%p912_p13), %s751_s17   ;;  %s1217_s22 = smov (!%p912_p13), %s749_s16  }
 0x1e8   : > { %842 = sbr.rel (%p912_p13) target bundleno = 505 (0x1f9), region = 135  ;;  %s1221_s24 = smov (!%p912_p13), 0  }
 0x1e9   : > { %s1225_s25 = smov (!%p912_p13), 0  }
 0x1ef LB: >> { %v761_v52 = vld [vmem:[%s1219_s22] sm:$0xff]  ;;  %s763_s28 = sadd.s32 1, %s1223_s24  ;;  %s755_s25 = sadd.s32 1, %s1227_s25   ;;  %s1227_s25 = sphi %s1225_s25, %s755_s25   ;;  %s1223_s24 = sphi %s1221_s24, %s1222_s24   ;;  %s1219_s22 = sphi %s1217_s22, %s768_s22   ;;  %s1215_s19 = sphi %s1213_s19, %s769_s19  }
 0x1f0   : >> { %762 = vst [vmem:[%s1215_s19] sm:$0xff] %v761_v52  ;;  %p764_p0 = scmp.ge.s32.totalorder %s763_s28, %s1140_s18  ;;  %p754_p1 = scmp.ge.s32.totalorder %s755_s25, %s1140_s18 }
 0x1f2   : >> { %s1542_s28 = smov (%p764_p0, %s763_s28), 0  ;;  %757 = sbr.rel (!%p754_p1) target bundleno = 495 (0x1ef), region = 141 }
 0x1f3   : >> { %s913_s20 = sshll.u32 %s1542_s28, 3  ;;  %s1222_s24 = smov %s1542_s28  }
 0x1f4   : >> { %s768_s22 = scalar_lea.vmem %s749_s16, %s913_s20 [#allocation3]   ;;  %s769_s19 = scalar_lea.vmem %s751_s17, %s913_s20  }
 0x1f9 PF: > { %p13_p2 = scmp.ge.s32.totalorder %s1280_s23, 4   ;;  %s1534_s20 = smov %s1191_s21 }
 0x1fa   : > { %s1535_s21 = smov %s1288_s26  ;;  %s1536_s22 = smov %s1280_s23 }
 0x1fb   :  { %15 = sbr.rel (!%p13_p2) target bundleno = 4 (0x4), region = 152 }

</bundles_post_ra>
